<compile_context>
chip_gen: v5e
topology: v5e:2x2
jax: 0.10.0
libtpu: 0.0.40
codegen_flags: <defaults>
</compile_context>

<pallas_src>
import numpy as np
import jax
import jax.numpy as jnp
from jax.experimental import pallas as pl
from jax.experimental.pallas import tpu as pltpu

PERIODS = (0.25, 0.5, 1.0, 2.0)
SMOOTHING_FACTOR = 0.1
TWO_PI = 2.0 * np.pi
K_BASIS = 2 * len(PERIODS) + 2        # [sin rows | cos rows | ones | t]  -> 10
K_PAD = 16                            # sublane-aligned padded basis rows


def _insar_kernel(coef_ref, basis_ref, out_ref):
    # Single (tm, K) @ (K, tT) MXU dot -> lane-dense store.  All per-station math
    # (spatial smoothing, phase trig, offset/trend) was hoisted into `coef` wrapper-side.
    out_ref[...] = jnp.dot(coef_ref[...], basis_ref[...],
                           preferred_element_type=jnp.float32)


def _round_up(x, m):
    return ((x + m - 1) // m) * m


def _pick_tiles(N, T, tm_target=512, tT_target=2048):
    """Aligned tiles + padded extents.  Never falls back to a giant untiled axis."""
    tm = min(_round_up(N, 8), tm_target)          # sublane-aligned station tile
    tT = min(_round_up(T, 128), tT_target)        # lane-aligned time tile (unmasked vst)
    Np = _round_up(N, tm)
    Tp = _round_up(T, tT)
    return tm, tT, Np, Tp


def build_time_basis(time_vec):
    """Parameter-independent (K_PAD, T) time basis.  Build ONCE per time vector."""
    t = time_vec.astype(jnp.float32)
    T = t.shape[0]
    omegas = jnp.asarray([TWO_PI / p for p in PERIODS], dtype=jnp.float32)   # w_i = 2*pi/period
    wt = omegas[:, None] * t[None, :]                                        # (4, T)
    basis = jnp.concatenate(
        [jnp.sin(wt), jnp.cos(wt),
         jnp.ones((1, T), jnp.float32), t[None, :]], axis=0)                 # (10, T)
    return jnp.pad(basis, ((0, K_PAD - K_BASIS), (0, 0)))                    # (16, T)


def spatial_insar_forward(S, amps, phases, offset, trend, basis):
    """All arrays float32. S:(N,N) amps/phases:(N,4) offset/trend:(N,) basis:(K_PAD,T)."""
    N = offset.shape[0]
    T = basis.shape[1]

    # --- per-step coefficient precompute (tiny plain-JAX work, once per forward) -------
    # amp*sin(w t + ph) = amp*cos(ph)*sin(w t) + amp*sin(ph)*cos(w t); smoothing fused
    # into a single (N,N)@(N,8) dot; offset/trend appended so the kernel is one matmul.
    sm = S @ jnp.concatenate([amps, phases], axis=1).astype(jnp.float32)     # (N, 8)
    sm_amp, sm_ph = sm[:, :4], sm[:, 4:]
    coef = jnp.concatenate(
        [sm_amp * jnp.cos(sm_ph),          # multiplies sin(w_i t)
         sm_amp * jnp.sin(sm_ph),          # multiplies cos(w_i t)
         offset.reshape(N, 1).astype(jnp.float32),
         trend.reshape(N, 1).astype(jnp.float32)], axis=1)                   # (N, 10)
    coef = jnp.pad(coef, ((0, 0), (0, K_PAD - K_BASIS)))                     # (N, 16)

    # --- tiling / padding ----------------------------------------------------------------
    tm, tT, Np, Tp = _pick_tiles(N, T)
    coef_p = jnp.pad(coef, ((0, Np - N), (0, 0)))
    basis_p = jnp.pad(basis, ((0, 0), (0, Tp - T)))
    grid = (Np // tm, Tp // tT)

    cost = pl.CostEstimate(
        flops=2 * Np * Tp * K_PAD,
        transcendentals=0,
        bytes_accessed=4 * (Np * K_PAD + K_PAD * Tp + Np * Tp))

    out = pl.pallas_call(
        _insar_kernel,
        out_shape=jax.ShapeDtypeStruct((Np, Tp), jnp.float32),
        grid=grid,
        in_specs=[
            pl.BlockSpec((tm, K_PAD), lambda i, j: (i, 0)),   # coefficients for this tile
            pl.BlockSpec((K_PAD, tT), lambda i, j: (0, j)),   # time basis columns
        ],
        out_specs=pl.BlockSpec((tm, tT), lambda i, j: (i, j)),
        compiler_params=pltpu.CompilerParams(
            dimension_semantics=("parallel", "parallel"),     # shardable across v7x TCs
            vmem_limit_bytes=64 * 1024 * 1024),               # fits v7x's 64 MiB VMEM/TC
        cost_estimate=cost,
    )(coef_p, basis_p)

    return out[:N, :T]


def build_spatial_graph(coordinates, n_neighbors):
    """Brute-force KNN (Euclidean), mirrors sklearn NearestNeighbors semantics."""
    coords = np.asarray(coordinates, dtype=np.float64)
    d2 = np.sum((coords[:, None, :] - coords[None, :, :]) ** 2, axis=-1)
    dist = np.sqrt(d2)
    order = np.argsort(dist, axis=1)                    # self is column 0 (dist 0)
    idx = order[:, 1:n_neighbors + 1]                   # (N, K)
    nd = np.take_along_axis(dist, idx, axis=1)          # (N, K)
    # _compute_spatial_weights: exp(-d / mean(d)), row-normalized
    w = np.exp(-nd / np.mean(nd))
    w = w / np.sum(w, axis=1, keepdims=True)
    return idx.astype(np.int32), w.astype(np.float32)


def build_smoothing_matrix(neighbor_idx, neighbor_w, n_stations, smoothing_factor=SMOOTHING_FACTOR):
    """S such that S @ p == (1-a)*p + a * sum_k w[s,k] * p[idx[s,k]]."""
    W = np.zeros((n_stations, n_stations), dtype=np.float32)
    rows = np.repeat(np.arange(n_stations), neighbor_idx.shape[1])
    np.add.at(W, (rows, neighbor_idx.reshape(-1)), neighbor_w.reshape(-1))
    S = (1.0 - smoothing_factor) * np.eye(n_stations, dtype=np.float32) + smoothing_factor * W
    return jnp.asarray(S)


def reference_forward(S, amps, phases, offset, trend, time_vec):
    """Pure-JAX reference mirroring the PyTorch forward (direct sin form)."""
    sm_a = S @ amps
    sm_p = S @ phases
    t = time_vec[None, :]
    sig = offset[:, None] + trend[:, None] * t
    for i, period in enumerate(PERIODS):
        sig = sig + sm_a[:, i:i + 1] * jnp.sin(TWO_PI * (1.0 / period) * t + sm_p[:, i:i + 1])
    return sig


if __name__ == "__main__":
    n_stations = 64
    n_timepoints = 128
    n_neighbors = 5

    key = jax.random.PRNGKey(0)
    k_coord, k_rates, k_phase = jax.random.split(key, 3)

    # Station coordinates (lon/lat-like) and PS00 subsidence rates.
    coordinates = np.asarray(
        jax.random.uniform(k_coord, (n_stations, 2), dtype=jnp.float32) * 10.0
    )
    ps00_rates = jax.random.normal(k_rates, (n_stations,), dtype=jnp.float32) * 5.0

    # Module parameters, initialized exactly as in __init__ (deterministic).
    constant_offset = jnp.zeros((n_stations,), dtype=jnp.float32)
    seasonal_amplitudes = jnp.ones((n_stations, 4), dtype=jnp.float32) * 3.0
    seasonal_phases = jax.random.uniform(k_phase, (n_stations, 4), dtype=jnp.float32) * TWO_PI

    # Spatial graph -> dense smoothing matrix (host-side glue; sklearn-equivalent KNN).
    nbr_idx, nbr_w = build_spatial_graph(coordinates, n_neighbors)
    S = build_smoothing_matrix(nbr_idx, nbr_w, n_stations)

    # Time vector in years (monthly sampling); constant time basis built ONCE.
    time_vector = jnp.arange(n_timepoints, dtype=jnp.float32) / 12.0
    basis = jax.block_until_ready(build_time_basis(time_vector))

    fwd = jax.jit(spatial_insar_forward)
    out = fwd(S, seasonal_amplitudes, seasonal_phases, constant_offset, ps00_rates, basis)
    out = jax.block_until_ready(out)

    ref = reference_forward(
        S, seasonal_amplitudes, seasonal_phases, constant_offset, ps00_rates, time_vector
    )
    assert out.shape == (n_stations, n_timepoints)
    np.testing.assert_allclose(np.asarray(out), np.asarray(ref), rtol=1e-4, atol=1e-4)

    print("KERNEL_OK")
</pallas_src>

<mosaic_0001>
module attributes {stable_mosaic.version = 11 : i64} {
  func.func @_insar_kernel(%arg0: i32, %arg1: i32, %arg2: memref<64x16xf32, #tpu.memory_space<vmem>>, %arg3: memref<16x128xf32, #tpu.memory_space<vmem>>, %arg4: memref<64x128xf32, #tpu.memory_space<vmem>>) attributes {dimension_semantics = [#tpu.dimension_semantics<parallel>, #tpu.dimension_semantics<parallel>], iteration_bounds = array<i64: 1, 1>, scalar_prefetch = 0 : i64, scratch_operands = 0 : i64, tpu.core_type = #tpu.core_type<tc>, window_params = [{transform_indices = @transform_0, window_bounds = array<i64: 64, 16>}, {transform_indices = @transform_1, window_bounds = array<i64: 16, 128>}, {transform_indices = @transform_2, window_bounds = array<i64: 64, 128>}]} {
    %c0 = arith.constant 0 : index
    %c0_0 = arith.constant 0 : index
    %0 = vector.load %arg2[%c0, %c0_0] : memref<64x16xf32, #tpu.memory_space<vmem>>, vector<64x16xf32>
    %c0_1 = arith.constant 0 : index
    %c0_2 = arith.constant 0 : index
    %1 = vector.load %arg3[%c0_1, %c0_2] : memref<16x128xf32, #tpu.memory_space<vmem>>, vector<16x128xf32>
    %cst = arith.constant dense<0.000000e+00> : vector<64x128xf32>
    %2 = tpu.matmul %0, %1, %cst {dimension_numbers = #tpu.dot_dimension_numbers<[1], [0], [0], [1], [0, 0, 1, 1], [], []>} : vector<64x16xf32>, vector<16x128xf32>, vector<64x128xf32> -> vector<64x128xf32>
    %c0_3 = arith.constant 0 : index
    %c0_4 = arith.constant 0 : index
    %3 = vector.load %arg4[%c0_3, %c0_4] : memref<64x128xf32, #tpu.memory_space<vmem>>, vector<64x128xf32>
    tpu.vector_store %arg4[%c0_3, %c0_4], %2 {strides = array<i32>} : memref<64x128xf32, #tpu.memory_space<vmem>>, vector<64x128xf32>,
    return
  }
  func.func @transform_0(%arg0: i32, %arg1: i32) -> (i32, i32) {
    %c0_i32 = arith.constant 0 : i32
    %c0_i32_0 = arith.constant 0 : i32
    return %arg0, %c0_i32 : i32, i32
  }
  func.func @transform_1(%arg0: i32, %arg1: i32) -> (i32, i32) {
    %c0_i32 = arith.constant 0 : i32
    %c0_i32_0 = arith.constant 0 : i32
    return %c0_i32, %arg1 : i32, i32
  }
  func.func @transform_2(%arg0: i32, %arg1: i32) -> (i32, i32) {
    %c0_i32 = arith.constant 0 : i32
    return %arg0, %arg1 : i32, i32
  }
}

</mosaic_0001>

<bundles_post_ra>
// kernel: spatial_insar_forward.1
= control target key start
LH: loop header
LB: loop body
LE: loop exit
PB: predicated region body
PF: predicated region fallthrough
CT: control target
= control target key end

     0   :  { %vm22_vm0 = vcmask 130048   ;;  %s216_s0 = inlined_call_operand.vmem [shape: f32[64,16], index: 0, kind: input, shape index: {}]   ;;  %s217_s1 = inlined_call_operand.vmem [shape: f32[16,128], index: 1, kind: input, shape index: {}]   ;;  %s218_s2 = inlined_call_operand.hbm [shape: f32[64,128], index: 2, kind: output, shape index: {}]  }
   0x1   :  { %v21_v0 = vld [vmem:[%s217_s1 + $0x8] sm:$0xff]  ;;  %v20_v1 = vld [vmem:[%s217_s1] sm:$0xff]  ;;  %v18_v3 = vld [vmem:[%s216_s0 + $0x30] sm:$0xff] }
   0x2   :  { %123 = vmatpush.msra.mxu2 %v21_v0  ;;  %124 = vmatpush.msra.mxu3 %v21_v0  ;;  %v16_v2 = vld [vmem:[%s216_s0 + $0x20] sm:$0xff]  ;;  %v14_v5 = vld [vmem:[%s216_s0 + $0x10] sm:$0xff] }
   0x3   :  { %61 = vmatpush.msra.mxu0 %v21_v0  ;;  %122 = vmatpush.msra.mxu1 %v21_v0  ;;  %v12_v4 = vld [vmem:[%s216_s0] sm:$0xff] }
   0x4   :  { %126 = vmatpush.msra.mxu2 %v20_v1  ;;  %127 = vmatpush.msra.mxu3 %v20_v1 }
   0x5   :  { %7 = vsyncpa [#allocation3], 0  ;;  %118 = vmatmul.msk.f32.vlgmr.msra.gmra.mxu2 %vm22_vm0, %v16_v2  ;;  %120 = vmatmul.msk.f32.vlgmr.msra.gmra.mxu3 %vm22_vm0, %v18_v3  ;;  %v17_v6 = vld [vmem:[%s216_s0 + $0x28] sm:$0xff]  ;;  %v19_v7 = vld [vmem:[%s216_s0 + $0x38] sm:$0xff]  ;;  %s157_s28 = smov [#allocation2]   ;;  %s102_s3 = sshll.u32 %s218_s2, 4  ;;  %s103_s3 = int_to_ptr.hbm [resolvable:$true] %s102_s3 }
   0x6   :  { %62 = vmatpush.msra.mxu0 %v20_v1  ;;  %125 = vmatpush.msra.mxu1 %v20_v1  ;;  %v13_v8 = vld [vmem:[%s216_s0 + $0x8] sm:$0xff]  ;;  %v15_v9 = vld [vmem:[%s216_s0 + $0x18] sm:$0xff]  ;;  %s100_s0 = sshll.u32 %s157_s28, 4  ;;  %s158_s4 = smov 128   ;;  %s101_s0 = int_to_ptr.vmem [resolvable:$true] %s100_s0 }
   0x7   :  { %114 = vmatmul.msk.f32.vlgmr.msra.gmra.mxu0 %vm22_vm0, %v12_v4  ;;  %116 = vmatmul.msk.f32.vlgmr.msra.gmra.mxu1 %vm22_vm0, %v14_v5  ;;  %s159_s5 = smov 8  }
   0xd   :  { %119 = vmatmul.msk.f32.gmra.mxu2 %vm22_vm0, %v17_v6  ;;  %121 = vmatmul.msk.f32.gmra.mxu3 %vm22_vm0, %v19_v7 }
   0xf   :  { %115 = vmatmul.msk.f32.gmra.mxu0 %vm22_vm0, %v13_v8  ;;  %117 = vmatmul.msk.f32.gmra.mxu1 %vm22_vm0, %v15_v9 }
  0x84   :  { %v64_v10 = vpop.f32.mrf.mxu0  ;;  %v70_v11 = vpop.f32.mrf.mxu1 }
  0x85   :  { %88 = vst [vmem:[#allocation2] sm:$0xff] %v64_v10 }
  0x86   :  { %90 = vst [vmem:[#allocation2 + $0x10] sm:$0xff] %v70_v11 }
  0x88   :  { %v76_v12 = vpop.f32.mrf.mxu2  ;;  %v82_v13 = vpop.f32.mrf.mxu3 }
  0x89   :  { %92 = vst [vmem:[#allocation2 + $0x20] sm:$0xff] %v76_v12 }
  0x8a   :  { %94 = vst [vmem:[#allocation2 + $0x30] sm:$0xff] %v82_v13 }
  0x8c   :  { %v67_v14 = vpop.f32.mrf.mxu0  ;;  %v73_v15 = vpop.f32.mrf.mxu1 }
  0x8d   :  { %89 = vst [vmem:[#allocation2 + $0x8] sm:$0xff] %v67_v14 }
  0x8e   :  { %91 = vst [vmem:[#allocation2 + $0x18] sm:$0xff] %v73_v15 }
  0x90   :  { %v79_v16 = vpop.f32.mrf.mxu2  ;;  %v85_v17 = vpop.f32.mrf.mxu3 }
  0x91   :  { %93 = vst [vmem:[#allocation2 + $0x28] sm:$0xff] %v79_v16 }
  0x92   :  { %95 = vst [vmem:[#allocation2 + $0x38] sm:$0xff] %v85_v17 }
  0x93   :  { %108 = dma.vmem_to_hbm [thread:$0]  %s101_s0, 1024, %s103_s3, [#allocation3], %s158_s4, %s158_s4, %s159_s5  }
  0x94   :  { %155 = dma.done.wait [#allocation3], 1024  }
  0x95   :  { %156 = vsyncadd [#allocation3], 4294966272 }
  0x96   :  { %113 = vsyncpa [#allocation3], 1 }

</bundles_post_ra>
